<compile_context>
chip_gen: v7x
topology: tpu7x:2x2x1
jax: 0.10.0
libtpu: 0.0.40
codegen_flags: <defaults>
</compile_context>

<pallas_src>
import math

import jax
import jax.numpy as jnp
from jax.experimental import pallas as pl
from jax.experimental.pallas import tpu as pltpu

_LANES = 128
_SUBLANES = 8
_DEFAULT_TILE_BYTE_BUDGET = 2 * 1024 * 1024      # ~2 MiB x tile -> ~8 MiB pipeline
_V5E_SCOPED_VMEM_BYTES = 16 * 1024 * 1024        # smallest default scoped VMEM limit
_SPLIT_THRESHOLD_BYTES = 1 * 1024 * 1024         # only force >=2 tiles when worth it


def _scale_kernel(x_ref, s_ref, o_ref):
    # Single VPU elementwise multiply; no relayouts. The multiply runs in the
    # promoted dtype (e.g. bf16 * f32 -> f32); only the store casts back.
    o_ref[...] = (x_ref[...] * s_ref[...]).astype(o_ref.dtype)


def _round_down_multiple(v, m):
    return (v // m) * m


def _round_up_multiple(v, m):
    return -(-v // m) * m


def scale_forward(x, scale, *, tile_byte_budget=_DEFAULT_TILE_BYTE_BUDGET):
    """Pallas equivalent of Scale.forward: x * scale (broadcast along last dim)."""
    orig_shape = x.shape
    D = orig_shape[-1]
    M = int(math.prod(orig_shape[:-1])) if len(orig_shape) > 1 else 1

    # Fold all leading dims into rows: one lane-dense [M, D] slab.
    x2 = x.reshape(M, D)
    s2 = scale.reshape(1, D)                 # keep parameter dtype; promote in-kernel

    # --- Lane-dense repacking -------------------------------------------------
    # If D is not a multiple of the 128-lane width, every store would be a masked
    # partial store and vregs would be under-filled. Pack k consecutive rows into
    # one lane-dense row of width k*D (a free, contiguous reshape) and tile the
    # scale k times. Only done when it is free (M % k == 0).
    k = _LANES // math.gcd(D, _LANES)
    if k > 1 and M >= k and M % k == 0:
        M_p, D_p = M // k, k * D
        x2 = x2.reshape(M_p, D_p)
        s2 = jnp.tile(scale, k).reshape(1, D_p)
    else:
        M_p, D_p = M, D

    # --- Byte-budgeted row tiling ---------------------------------------------
    itemsize = jnp.dtype(x.dtype).itemsize
    bytes_per_row = D_p * itemsize
    tile_m = max(_SUBLANES,
                 _round_down_multiple(max(1, tile_byte_budget // bytes_per_row),
                                      _SUBLANES))
    tile_m = min(tile_m, M_p)

    # Ensure >=2 grid steps when the problem is big enough to split, so
    # dimension_semantics=("parallel",) can shard tiles across v7x's two
    # TensorCores (costs only one extra ~0.35us step on v5e/v6e).
    if tile_m >= M_p and M_p * bytes_per_row >= _SPLIT_THRESHOLD_BYTES:
        half = _round_up_multiple(pl.cdiv(M_p, 2), _SUBLANES)
        if half < M_p:
            tile_m = half

    # Pipeline footprint: double-buffered input tile + double-buffered output tile
    # + resident scale block. Must fit the smallest default scoped VMEM (v5e, 16 MiB)
    # with slack, so no vmem_limit_bytes override is required on any generation.
    tile_bytes = tile_m * bytes_per_row
    scale_bytes = D_p * jnp.dtype(scale.dtype).itemsize
    pipeline_bytes = 4 * tile_bytes + 2 * scale_bytes
    assert pipeline_bytes <= _V5E_SCOPED_VMEM_BYTES - (2 << 20), (
        "tile budget too large for default scoped VMEM")

    grid = (pl.cdiv(M_p, tile_m),)

    out = pl.pallas_call(
        _scale_kernel,
        out_shape=jax.ShapeDtypeStruct((M_p, D_p), x.dtype),
        grid=grid,
        in_specs=[
            pl.BlockSpec((tile_m, D_p), lambda i: (i, 0)),   # x row tile
            pl.BlockSpec((1, D_p), lambda i: (0, 0)),        # scale, VMEM-resident
        ],
        out_specs=pl.BlockSpec((tile_m, D_p), lambda i: (i, 0)),
        compiler_params=pltpu.CompilerParams(
            dimension_semantics=("parallel",)),              # v7x: shard tiles over 2 TCs
    )(x2, s2)

    return out.reshape(orig_shape)


if __name__ == "__main__":
    key = jax.random.PRNGKey(0)
    kx, ks, kx2, kx3 = jax.random.split(key, 4)

    # Metaformer usage: x is [B, N, D] ("b n d"), Scale(dim=D). D=64 exercises the
    # lane-dense repacking path (k=2 -> 128-wide packed rows).
    B, N, D = 2, 8, 64
    x = jax.random.normal(kx, (B, N, D), dtype=jnp.float32)
    # Emulate a trained parameter (module init is init_value * ones(dim)).
    scale = 1.0 + 0.1 * jax.random.normal(ks, (D,), dtype=jnp.float32)

    out = jax.block_until_ready(scale_forward(x, scale))
    ref = x * scale
    assert out.shape == x.shape and out.dtype == x.dtype
    assert jnp.allclose(out, ref, rtol=1e-6, atol=1e-6), "mismatch vs reference (f32)"

    # Ragged / multi-step grid: small byte budget forces several row tiles and a
    # masked final tile (M_p = 75 rows, tile_m = 32).
    x_r = jax.random.normal(kx2, (3, 50, D), dtype=jnp.float32)
    out_r = jax.block_until_ready(
        scale_forward(x_r, scale, tile_byte_budget=16 * 1024))
    assert jnp.allclose(out_r, x_r * scale, rtol=1e-6, atol=1e-6), "mismatch (ragged)"

    # Mixed precision: bf16 activations * f32 parameter -> multiply in f32, store bf16.
    x_bf = jax.random.normal(kx3, (B, N, D), dtype=jnp.bfloat16)
    out_bf = jax.block_until_ready(scale_forward(x_bf, scale))
    ref_bf = (x_bf.astype(jnp.float32) * scale).astype(jnp.bfloat16)
    assert out_bf.dtype == jnp.bfloat16
    assert jnp.allclose(out_bf.astype(jnp.float32), ref_bf.astype(jnp.float32),
                        rtol=2e-2, atol=2e-2), "mismatch vs reference (bf16)"

    print("KERNEL_OK")
</pallas_src>

<mosaic_0001>
module attributes {stable_mosaic.version = 11 : i64} {
  func.func @_scale_kernel(%arg0: i32, %arg1: memref<8x128xf32, #tpu.memory_space<vmem>>, %arg2: memref<1x128xf32, #tpu.memory_space<vmem>>, %arg3: memref<8x128xf32, #tpu.memory_space<vmem>>) attributes {dimension_semantics = [#tpu.dimension_semantics<parallel>], iteration_bounds = array<i64: 1>, scalar_prefetch = 0 : i64, scratch_operands = 0 : i64, tpu.core_type = #tpu.core_type<tc>, window_params = [{transform_indices = @transform_0, window_bounds = array<i64: 8, 128>}, {pipeline_mode = #tpu.pipeline_mode<synchronous>, transform_indices = @transform_1, window_bounds = array<i64: 1, 128>}, {transform_indices = @transform_2, window_bounds = array<i64: 8, 128>}]} {
    %c0 = arith.constant 0 : index
    %c0_0 = arith.constant 0 : index
    %0 = vector.load %arg1[%c0, %c0_0] : memref<8x128xf32, #tpu.memory_space<vmem>>, vector<8x128xf32>
    %c0_1 = arith.constant 0 : index
    %c0_2 = arith.constant 0 : index
    %1 = vector.load %arg2[%c0_1, %c0_2] : memref<1x128xf32, #tpu.memory_space<vmem>>, vector<1x128xf32>
    %2 = vector.broadcast %1 : vector<1x128xf32> to vector<8x128xf32>
    %3 = arith.mulf %0, %2 : vector<8x128xf32>
    %c0_3 = arith.constant 0 : index
    %c0_4 = arith.constant 0 : index
    %4 = vector.load %arg3[%c0_3, %c0_4] : memref<8x128xf32, #tpu.memory_space<vmem>>, vector<8x128xf32>
    tpu.vector_store %arg3[%c0_3, %c0_4], %3 {strides = array<i32>} : memref<8x128xf32, #tpu.memory_space<vmem>>, vector<8x128xf32>,
    return
  }
  func.func @transform_0(%arg0: i32) -> (i32, i32) {
    %c0_i32 = arith.constant 0 : i32
    %c0_i32_0 = arith.constant 0 : i32
    return %arg0, %c0_i32 : i32, i32
  }
  func.func @transform_1(%arg0: i32) -> (i32, i32) {
    %c0_i32 = arith.constant 0 : i32
    %c0_i32_0 = arith.constant 0 : i32
    %c0_i32_1 = arith.constant 0 : i32
    return %c0_i32, %c0_i32_0 : i32, i32
  }
  func.func @transform_2(%arg0: i32) -> (i32, i32) {
    %c0_i32 = arith.constant 0 : i32
    %c0_i32_0 = arith.constant 0 : i32
    return %arg0, %c0_i32 : i32, i32
  }
}

</mosaic_0001>

<bundles_post_ra>
// kernel: tpu_custom_call.1
= control target key start
LH: loop header
LB: loop body
LE: loop exit
PB: predicated region body
PF: predicated region fallthrough
CT: control target
= control target key end

     0   :  { %7 = vsyncpa [#allocation3], 0  ;;  %s144_s0 = inlined_call_operand.hbm [shape: f32[8,128], index: 0, kind: input, shape index: {}]   ;;  %s145_s1 = inlined_call_operand.vmem [shape: f32[1,128], index: 1, kind: input, shape index: {}]   ;;  %s146_s2 = inlined_call_operand.hbm [shape: f32[8,128], index: 2, kind: output, shape index: {}]  }
   0x1   :  { %8 = vsyncpa [#allocation4], 0  ;;  %s100_s9 = smov [#allocation2]   ;;  %s52_s13 = scalar_lea.hbm %s144_s0, 128 }
   0x2   :  { %s15_s10 = sshll.u32 %s100_s9, 4  ;;  %p53_p0 = scmp.ne.s32.totalorder %s144_s0, %s52_s13  ;;  %s16_s10 = int_to_ptr.vmem [resolvable:$true] %s15_s10 }
   0x3   :  { %p56_p1 = scmp.lt.u32.totalorder %s52_s13, %s144_s0 }
   0x5   :  { %p58_p2 = pnand %p56_p1, %p53_p0 }
   0x7   :  { %61 = shalt.err (!%p58_p2)
}
   0x8   :  { %s62_s18 = scalar_lea.vmem %s16_s10, 128  ;;  %p67_p4 = scmp.lt.s32.totalorder %s16_s10, %s16_s10 }
   0x9   :  { %p63_p3 = scmp.ne.s32.totalorder %s16_s10, %s62_s18  ;;  %p68_p5 = scmp.lt.s32.totalorder %s62_s18, %s62_s18 }
   0xb   :  { %p69_p6 = por %p68_p5, %p67_p4 }
   0xd   :  { %p70_p7 = pnand %p69_p6, %p63_p3 }
   0xf   :  { %73 = shalt.err (!%p70_p7)
}
  0x10   :  { %18 = dma.hbm_to_vmem [thread:$0]  %s144_s0, 128, %s16_s10, [#allocation3]  }
  0x11   :  { %96 = dma.done.wait [#allocation3], 128  }
  0x12   :  { %97 = vsyncadd [#allocation3], 4294967168  ;;  %s101_s21 = smov [#allocation5]   ;;  %v24_v0 = vld [vmem:[#allocation2] sm:$0xff] }
  0x13   :  { %s40_s22 = sshll.u32 %s101_s21, 4  ;;  %v49_v1 = vld [vmem:[%s145_s1] ss:$0 sm:$0xff]  ;;  %s41_s22 = int_to_ptr.vmem [resolvable:$true] %s40_s22 }
  0x14   :  { %v32_v2 = vmul.f32 %v49_v1, %v24_v0  ;;  %s74_s25 = scalar_lea.vmem %s41_s22, 128  ;;  %p79_p9 = scmp.lt.s32.totalorder %s41_s22, %s41_s22 }
  0x15   :  { %p75_p8 = scmp.ne.s32.totalorder %s41_s22, %s74_s25  ;;  %p80_p10 = scmp.lt.s32.totalorder %s74_s25, %s74_s25 }
  0x16   :  { %33 = vst [vmem:[#allocation5] sm:$0xff] %v32_v2 }
  0x17   :  { %p81_p11 = por %p80_p10, %p79_p9 }
  0x19   :  { %p82_p12 = pnand %p81_p11, %p75_p8 }
  0x1b   :  { %85 = shalt.err (!%p82_p12)
}
  0x1c   :  { %s86_s27 = scalar_lea.hbm %s146_s2, 128 }
  0x1d   :  { %p87_p13 = scmp.ne.s32.totalorder %s146_s2, %s86_s27  ;;  %p90_p0 = scmp.lt.u32.totalorder %s86_s27, %s146_s2 }
  0x1f   :  { %p92_p1 = pnand %p90_p0, %p87_p13 }
  0x21   :  { %95 = shalt.err (!%p92_p1)
}
  0x22   :  { %43 = dma.vmem_to_hbm [thread:$0]  %s41_s22, 128, %s146_s2, [#allocation4]  }
  0x23   :  { %98 = dma.done.wait [#allocation4], 128  }
  0x24   :  { %99 = vsyncadd [#allocation4], 4294967168 }
  0x25   :  { %47 = vsyncpa [#allocation3], 1 }
  0x26   :  { %48 = vsyncpa [#allocation4], 1 }

</bundles_post_ra>
